<compile_context>
chip_gen: v5e
topology: v5e:2x2
jax: 0.10.0
libtpu: 0.0.40
codegen_flags: <defaults>
</compile_context>

<pallas_src>
import math
import jax
import jax.numpy as jnp
from jax.experimental import pallas as pl
from jax.experimental.pallas import tpu as pltpu


def _round_up(n, m):
    return ((n + m - 1) // m) * m


def _make_mlp_kernel(num_layers, matmul_dtype):
    """Fused-MLP kernel body for a fixed (static) number of layers.

    Refs (in order):
      x_ref                 : (TB, num_features) float32  (one batch tile)
      w_refs[0..L-1]        : (in_i, out_i)      bf16     (VMEM-resident)
      b_refs[0..L-1]        : (1, out_i)         float32  (VMEM-resident)
      out_ref               : (TB, out_dim)      float32
    """

    def kernel(*refs):
        x_ref = refs[0]
        w_refs = refs[1:1 + num_layers]
        b_refs = refs[1 + num_layers:1 + 2 * num_layers]
        out_ref = refs[1 + 2 * num_layers]

        h = x_ref[...].astype(matmul_dtype)               # in-kernel bf16 cast
        for i in range(num_layers):
            # bf16 MXU matmul, f32 accumulate; bias add + activation in f32.
            y = jnp.dot(h, w_refs[i][...],
                        preferred_element_type=jnp.float32)
            y = y + b_refs[i][...]
            if i == num_layers - 1:
                # Final sigmoid over real columns only; narrow, lane-masked
                # store is cheaper than a 128-lane-padded f32 writeback.
                out_ref[...] = jax.nn.sigmoid(y).astype(out_ref.dtype)
            elif i == 0:
                h = jax.nn.sigmoid(y).astype(matmul_dtype)
            else:
                # torch.relu((x @ W + b) * 1.5); the 1.5 is pre-folded into
                # W and b by the wrapper, so only the max remains here.
                h = jnp.maximum(y, 0.0).astype(matmul_dtype)

    return kernel


def dt_neural_network_forward(x, weights, biases, *, block_batch=512,
                              matmul_dtype=jnp.bfloat16):
    """Fused DTNeuralNetwork forward pass as one batch-tiled Pallas kernel.

    x       : [batch, num_features] float32
    weights : list of [in_i, out_i] float32 arrays  (transpose of torch layout)
    biases  : list of [out_i]       float32 arrays
    """
    num_layers = len(weights)
    assert num_layers >= 2, "forward() semantics assume >= 2 layers"
    batch, num_features = x.shape
    out_dim = weights[-1].shape[1]

    # ---- one-time parameter prep (tiny tensors, done once per call) ---------
    # Fold the hidden layers' "* 1.5" into W and b, cast weights to bf16 for
    # the MXU, keep biases in f32 shaped (1, out) for broadcasting.
    w_list, b_list = [], []
    for i, (w, b) in enumerate(zip(weights, biases)):
        scale = 1.5 if 0 < i < num_layers - 1 else 1.0
        w_list.append((w * scale).astype(matmul_dtype))
        b_list.append((b * scale).astype(jnp.float32).reshape(1, -1))

    # ---- batch tiling --------------------------------------------------------
    # Multiple of 16 rows (bf16 sublane pairs); <= ceil(batch/2) so the grid
    # has >= 2 steps for v7x megacore whenever the batch allows it.  For tiny
    # batches the block spans the full (un-padded) batch dim, which is legal.
    if batch <= 16:
        tb = batch
    else:
        tb = min(block_batch, _round_up(-(-batch // 2), 16))
    grid = (pl.cdiv(batch, tb),)

    # ---- specs ---------------------------------------------------------------
    # Parameter blocks use constant index_maps: fetched once, VMEM-resident.
    param_specs = [pl.BlockSpec(w.shape, lambda g: (0, 0)) for w in w_list]
    param_specs += [pl.BlockSpec(b.shape, lambda g: (0, 0)) for b in b_list]
    in_specs = [pl.BlockSpec((tb, num_features), lambda g: (g, 0))] + param_specs
    out_specs = pl.BlockSpec((tb, out_dim), lambda g: (g, 0))

    # ---- advisory cost estimate (real, un-padded footprint) ------------------
    dims = [num_features] + [w.shape[1] for w in weights]
    flops = 2 * batch * sum(dims[i] * dims[i + 1] for i in range(num_layers))
    transcendentals = batch * (dims[1] + dims[-1])           # the two sigmoids
    bytes_accessed = (x.size * x.dtype.itemsize
                      + sum(w.size * w.dtype.itemsize for w in w_list)
                      + sum(b.size * b.dtype.itemsize for b in b_list)
                      + batch * out_dim * 4)

    kernel = _make_mlp_kernel(num_layers, matmul_dtype)
    out = pl.pallas_call(
        kernel,
        out_shape=jax.ShapeDtypeStruct((batch, out_dim), jnp.float32),
        grid=grid,
        in_specs=in_specs,
        out_specs=out_specs,
        compiler_params=pltpu.CompilerParams(
            dimension_semantics=("parallel",),
            vmem_limit_bytes=32 * 1024 * 1024),
        cost_estimate=pl.CostEstimate(
            flops=flops,
            transcendentals=transcendentals,
            bytes_accessed=bytes_accessed),
    )(x, *w_list, *b_list)
    return out


def init_params(key, num_features, layer_sizes):
    """Deterministic init mirroring nn.Linear's default U(-1/sqrt(fan_in), +)."""
    dims = [num_features] + list(layer_sizes)
    weights, biases = [], []
    for i in range(len(layer_sizes)):
        fan_in, fan_out = dims[i], dims[i + 1]
        key, kw, kb = jax.random.split(key, 3)
        bound = 1.0 / math.sqrt(fan_in)
        # Stored as [in, out] (transpose of PyTorch's [out, in]); math identical.
        w = jax.random.uniform(kw, (fan_in, fan_out), jnp.float32, -bound, bound)
        b = jax.random.uniform(kb, (fan_out,), jnp.float32, -bound, bound)
        weights.append(w)
        biases.append(b)
    return weights, biases


def reference_forward(x, weights, biases):
    """Plain-JAX f32 reference reproducing the PyTorch forward exactly."""
    n = len(weights)
    h = jax.nn.sigmoid(x @ weights[0] + biases[0])
    for i in range(1, n - 1):
        h = jnp.maximum((h @ weights[i] + biases[i]) * 1.5, 0.0)
    h = jax.nn.sigmoid(h @ weights[-1] + biases[-1])
    return h


if __name__ == "__main__":
    key = jax.random.PRNGKey(0)

    # Small shapes consistent with the module's forward.
    num_features = 16
    layer_sizes = [32, 24, 8]
    batch = 4

    key, kx, kp = jax.random.split(key, 3)
    x = jax.random.normal(kx, (batch, num_features), jnp.float32)
    weights, biases = init_params(kp, num_features, layer_sizes)

    # Single-block path (batch=4 -> block spans the full batch dim).
    out = dt_neural_network_forward(x, weights, biases)
    out = jax.block_until_ready(out)
    ref = reference_forward(x, weights, biases)
    assert out.shape == (batch, layer_sizes[-1])
    # bf16 matmul operands / activations -> loosened tolerance vs f32 reference.
    assert jnp.allclose(out, ref, atol=2e-2, rtol=0.0), "mismatch vs reference"

    # Multi-step grid path (exercises the partial boundary block + megacore
    # sharding): batch=300 -> tb=160, grid of 2 steps, last block partial.
    key, kx2 = jax.random.split(key)
    x_big = jax.random.normal(kx2, (300, num_features), jnp.float32)
    out_big = dt_neural_network_forward(x_big, weights, biases)
    out_big = jax.block_until_ready(out_big)
    ref_big = reference_forward(x_big, weights, biases)
    assert out_big.shape == (300, layer_sizes[-1])
    assert jnp.allclose(out_big, ref_big, atol=2e-2, rtol=0.0), "mismatch (tiled)"

    print("KERNEL_OK")
</pallas_src>

<mosaic_0001>
module attributes {stable_mosaic.version = 11 : i64} {
  func.func @kernel(%arg0: i32, %arg1: memref<4x16xf32, #tpu.memory_space<vmem>>, %arg2: memref<16x32xbf16, #tpu.memory_space<vmem>>, %arg3: memref<32x24xbf16, #tpu.memory_space<vmem>>, %arg4: memref<24x8xbf16, #tpu.memory_space<vmem>>, %arg5: memref<1x32xf32, #tpu.memory_space<vmem>>, %arg6: memref<1x24xf32, #tpu.memory_space<vmem>>, %arg7: memref<1x8xf32, #tpu.memory_space<vmem>>, %arg8: memref<4x8xf32, #tpu.memory_space<vmem>>) attributes {dimension_semantics = [#tpu.dimension_semantics<parallel>], iteration_bounds = array<i64: 1>, scalar_prefetch = 0 : i64, scratch_operands = 0 : i64, tpu.core_type = #tpu.core_type<tc>, window_params = [{transform_indices = @transform_0, window_bounds = array<i64: 4, 16>}, {pipeline_mode = #tpu.pipeline_mode<synchronous>, transform_indices = @transform_1, window_bounds = array<i64: 16, 32>}, {pipeline_mode = #tpu.pipeline_mode<synchronous>, transform_indices = @transform_2, window_bounds = array<i64: 32, 24>}, {pipeline_mode = #tpu.pipeline_mode<synchronous>, transform_indices = @transform_3, window_bounds = array<i64: 24, 8>}, {pipeline_mode = #tpu.pipeline_mode<synchronous>, transform_indices = @transform_4, window_bounds = array<i64: 1, 32>}, {pipeline_mode = #tpu.pipeline_mode<synchronous>, transform_indices = @transform_5, window_bounds = array<i64: 1, 24>}, {pipeline_mode = #tpu.pipeline_mode<synchronous>, transform_indices = @transform_6, window_bounds = array<i64: 1, 8>}, {transform_indices = @transform_7, window_bounds = array<i64: 4, 8>}]} {
    %c0 = arith.constant 0 : index
    %c0_0 = arith.constant 0 : index
    %0 = vector.load %arg1[%c0, %c0_0] : memref<4x16xf32, #tpu.memory_space<vmem>>, vector<4x16xf32>
    %1 = arith.truncf %0 : vector<4x16xf32> to vector<4x16xbf16>
    %c0_1 = arith.constant 0 : index
    %c0_2 = arith.constant 0 : index
    %2 = vector.load %arg2[%c0_1, %c0_2] : memref<16x32xbf16, #tpu.memory_space<vmem>>, vector<16x32xbf16>
    %cst = arith.constant dense<0.000000e+00> : vector<4x32xf32>
    %3 = tpu.matmul %1, %2, %cst {dimension_numbers = #tpu.dot_dimension_numbers<[1], [0], [0], [1], [0, 0, 1, 1], [], []>} : vector<4x16xbf16>, vector<16x32xbf16>, vector<4x32xf32> -> vector<4x32xf32>
    %c0_3 = arith.constant 0 : index
    %c0_4 = arith.constant 0 : index
    %4 = vector.load %arg5[%c0_3, %c0_4] : memref<1x32xf32, #tpu.memory_space<vmem>>, vector<1x32xf32>
    %5 = vector.broadcast %4 : vector<1x32xf32> to vector<4x32xf32>
    %6 = arith.addf %3, %5 : vector<4x32xf32>
    %7 = arith.negf %6 : vector<4x32xf32>
    %8 = math.exp %7 : vector<4x32xf32>
    %cst_5 = arith.constant 1.000000e+00 : f32
    %9 = vector.broadcast %cst_5 : f32 to vector<4x32xf32>
    %10 = arith.addf %9, %8 : vector<4x32xf32>
    %11 = arith.divf %9, %10 : vector<4x32xf32>
    %12 = arith.truncf %11 : vector<4x32xf32> to vector<4x32xbf16>
    %c0_6 = arith.constant 0 : index
    %c0_7 = arith.constant 0 : index
    %13 = vector.load %arg3[%c0_6, %c0_7] : memref<32x24xbf16, #tpu.memory_space<vmem>>, vector<32x24xbf16>
    %cst_8 = arith.constant dense<0.000000e+00> : vector<4x24xf32>
    %14 = tpu.matmul %12, %13, %cst_8 {dimension_numbers = #tpu.dot_dimension_numbers<[1], [0], [0], [1], [0, 0, 1, 1], [], []>} : vector<4x32xbf16>, vector<32x24xbf16>, vector<4x24xf32> -> vector<4x24xf32>
    %c0_9 = arith.constant 0 : index
    %c0_10 = arith.constant 0 : index
    %15 = vector.load %arg6[%c0_9, %c0_10] : memref<1x24xf32, #tpu.memory_space<vmem>>, vector<1x24xf32>
    %16 = vector.broadcast %15 : vector<1x24xf32> to vector<4x24xf32>
    %17 = arith.addf %14, %16 : vector<4x24xf32>
    %cst_11 = arith.constant 0.000000e+00 : f32
    %18 = vector.broadcast %cst_11 : f32 to vector<4x24xf32>
    %19 = arith.maximumf %17, %18 : vector<4x24xf32>
    %20 = arith.truncf %19 : vector<4x24xf32> to vector<4x24xbf16>
    %c0_12 = arith.constant 0 : index
    %c0_13 = arith.constant 0 : index
    %21 = vector.load %arg4[%c0_12, %c0_13] : memref<24x8xbf16, #tpu.memory_space<vmem>>, vector<24x8xbf16>
    %cst_14 = arith.constant dense<0.000000e+00> : vector<4x8xf32>
    %22 = tpu.matmul %20, %21, %cst_14 {dimension_numbers = #tpu.dot_dimension_numbers<[1], [0], [0], [1], [0, 0, 1, 1], [], []>} : vector<4x24xbf16>, vector<24x8xbf16>, vector<4x8xf32> -> vector<4x8xf32>
    %c0_15 = arith.constant 0 : index
    %c0_16 = arith.constant 0 : index
    %23 = vector.load %arg7[%c0_15, %c0_16] : memref<1x8xf32, #tpu.memory_space<vmem>>, vector<1x8xf32>
    %24 = vector.broadcast %23 : vector<1x8xf32> to vector<4x8xf32>
    %25 = arith.addf %22, %24 : vector<4x8xf32>
    %26 = arith.negf %25 : vector<4x8xf32>
    %27 = math.exp %26 : vector<4x8xf32>
    %cst_17 = arith.constant 1.000000e+00 : f32
    %28 = vector.broadcast %cst_17 : f32 to vector<4x8xf32>
    %29 = arith.addf %28, %27 : vector<4x8xf32>
    %30 = arith.divf %28, %29 : vector<4x8xf32>
    %c0_18 = arith.constant 0 : index
    %c0_19 = arith.constant 0 : index
    %31 = vector.load %arg8[%c0_18, %c0_19] : memref<4x8xf32, #tpu.memory_space<vmem>>, vector<4x8xf32>
    tpu.vector_store %arg8[%c0_18, %c0_19], %30 {strides = array<i32>} : memref<4x8xf32, #tpu.memory_space<vmem>>, vector<4x8xf32>,
    return
  }
  func.func @transform_0(%arg0: i32) -> (i32, i32) {
    %c0_i32 = arith.constant 0 : i32
    %c0_i32_0 = arith.constant 0 : i32
    return %arg0, %c0_i32 : i32, i32
  }
  func.func @transform_1(%arg0: i32) -> (i32, i32) {
    %c0_i32 = arith.constant 0 : i32
    %c0_i32_0 = arith.constant 0 : i32
    %c0_i32_1 = arith.constant 0 : i32
    return %c0_i32, %c0_i32_0 : i32, i32
  }
  func.func @transform_2(%arg0: i32) -> (i32, i32) {
    %c0_i32 = arith.constant 0 : i32
    %c0_i32_0 = arith.constant 0 : i32
    %c0_i32_1 = arith.constant 0 : i32
    return %c0_i32, %c0_i32_0 : i32, i32
  }
  func.func @transform_3(%arg0: i32) -> (i32, i32) {
    %c0_i32 = arith.constant 0 : i32
    %c0_i32_0 = arith.constant 0 : i32
    %c0_i32_1 = arith.constant 0 : i32
    return %c0_i32, %c0_i32_0 : i32, i32
  }
  func.func @transform_4(%arg0: i32) -> (i32, i32) {
    %c0_i32 = arith.constant 0 : i32
    %c0_i32_0 = arith.constant 0 : i32
    %c0_i32_1 = arith.constant 0 : i32
    return %c0_i32, %c0_i32_0 : i32, i32
  }
  func.func @transform_5(%arg0: i32) -> (i32, i32) {
    %c0_i32 = arith.constant 0 : i32
    %c0_i32_0 = arith.constant 0 : i32
    %c0_i32_1 = arith.constant 0 : i32
    return %c0_i32, %c0_i32_0 : i32, i32
  }
  func.func @transform_6(%arg0: i32) -> (i32, i32) {
    %c0_i32 = arith.constant 0 : i32
    %c0_i32_0 = arith.constant 0 : i32
    %c0_i32_1 = arith.constant 0 : i32
    return %c0_i32, %c0_i32_0 : i32, i32
  }
  func.func @transform_7(%arg0: i32) -> (i32, i32) {
    %c0_i32 = arith.constant 0 : i32
    %c0_i32_0 = arith.constant 0 : i32
    return %arg0, %c0_i32 : i32, i32
  }
}

</mosaic_0001>

<bundles_post_ra>
// kernel: tpu_custom_call.1
= control target key start
LH: loop header
LB: loop body
LE: loop exit
PB: predicated region body
PF: predicated region fallthrough
CT: control target
= control target key end

     0   :  { %vm42_vm0 = vcmask 130048   ;;  %s326_s0 = inlined_call_operand.vmem [shape: f32[4,16], index: 0, kind: input, shape index: {}]   ;;  %s327_s1 = inlined_call_operand.vmem [shape: bf16[16,32], index: 1, kind: input, shape index: {}]   ;;  %s328_s2 = inlined_call_operand.vmem [shape: bf16[32,24], index: 2, kind: input, shape index: {}]   ;;  %s329_s3 = inlined_call_operand.vmem [shape: bf16[24,8], index: 3, kind: input, shape index: {}]   ;;  %s330_s4 = inlined_call_operand.vmem [shape: f32[1,32], index: 4, kind: input, shape index: {}]   ;;  %s331_s5 = inlined_call_operand.vmem [shape: f32[1,24], index: 5, kind: input, shape index: {}]   ;;  %s332_s6 = inlined_call_operand.vmem [shape: f32[1,8], index: 6, kind: input, shape index: {}]   ;;  %s333_s7 = inlined_call_operand.hbm [shape: f32[4,8], index: 7, kind: output, shape index: {}]  }
   0x1   :  { %v213_v0 = vld [vmem:[%s327_s1] sm:$0xff] }
   0x2   :  { %v28_v1 = vld [vmem:[%s326_s0] sm:$0xf]  ;;  %53 = vmatpush.bf16.msra.mxu0 %v213_v0 }
   0x3   :  { %v29_v2 = vpack.c.bf16 %v28_v1, %v28_v1 }
   0x4   :  { %12 = vsyncpa [#allocation3], 0  ;;  %v215_v3 = vld [vmem:[%s328_s2 + $0x8] sm:$0xff]  ;;  %v214_v4 = vld [vmem:[%s328_s2] sm:$0xff]  ;;  %vm99_vm5 = vcmask 261120   ;;  %vm138_vm6 = vcmask 1043456  }
   0x5   :  { %196 = vmatmul.msk.bf16.vlgmr.msra.gmra.mxu0 %vm42_vm0, %v29_v2  ;;  %109 = vmatpush.bf16.msra.mxu1 %v215_v3  ;;  %v218_v5 = vld [vmem:[%s330_s4] ss:$0 sm:$0xff]  ;;  %v120_v23 = vld [vmem:[%s329_s3 + $0x8] sm:$0xf]  ;;  %vm134_vm7 = vcmask 195584   ;;  %vm174_vm11 = vcmask 60416  }
   0x6   :  { %v130_v24 = vunpack.c.l.b16 %v120_v23  ;;  %v216_v27 = vld [vmem:[%s329_s3] sm:$0xff]  ;;  %s255_s3 = smov [#allocation2]  }
   0x7   :  { %v219_v28 = vld [vmem:[%s331_s5] ss:$0 sm:$0xff]  ;;  %s181_s5 = sshll.u32 %s255_s3, 4  ;;  %s182_s5 = int_to_ptr.vmem [resolvable:$true] %s181_s5 }
   0x8   :  { %v132_v25 = vpack.c.b16 %v130_v24, %v130_v24  ;;  %v220_v34 = vld [vmem:[%s332_s6] ss:$0 sm:$0xff]  ;;  %s183_s6 = sshll.u32 %s333_s7, 4  ;;  %s184_s6 = int_to_ptr.hbm [resolvable:$true] %s183_s6 }
   0x9   :  { %110 = vmatpush.bf16.msra.mxu1 %v214_v4 }
   0xa   :  { %v140_v26 = vsel %vm138_vm6, %v132_v25, 0 }
   0xb   :  { %148 = vmatpush.bf16.msra.mxu2 %v140_v26 }
   0xf   :  { %149 = vmatpush.bf16.msra.mxu2 %v216_v27 }
  0x82   :  { %v55_v6 = vpop.f32.mrf.mxu0 }
  0x83   :  { %v56_v7 = vadd.f32 %v218_v5, %v55_v6 }
  0x85   :  { %v197_v8 = vmul.f32 -1.442695, %v56_v7 }
  0x87   :  { %221 = vpow2.f32 %v197_v8 }
  0x8a   :  { %v57_v9 = vpop.f32.mrf.mxu0 }
  0x8d   :  { %v222_v10 = vpop.eup %221 }
  0x8e   :  { %v62_v11 = vadd.f32 1.0, %v222_v10 }
  0x90   :  { %223 = vrcp.f32 %v62_v11  ;;  %v74_v15 = vand.u32 2147483648, %v62_v11  ;;  %v72_v17 = vand.u32 2147483647, %v62_v11  ;;  %vm68_vm2 = vweird.f32 %v62_v11 }
  0x92   :  { %v75_v19 = vor.u32 1.1754944e-38, %v74_v15  ;;  %vm73_vm4 = vcmp.eq.f32.partialorder %v72_v17, 8.507059e+37 }
  0x96   :  { %v224_v12 = vpop.eup %223 }
  0x97   :  { %v64_v13 = vmul.f32 %v224_v12, %v62_v11  ;;  %vm69_vm1 = vweird.f32 %v224_v12 }
  0x98   :  { %vm70_vm3 = vmor %vm68_vm2, %vm69_vm1 }
  0x99   :  { %v65_v14 = vsub.f32 1.0, %v64_v13 }
  0x9b   :  { %v66_v16 = vmul.f32 %v224_v12, %v65_v14 }
  0x9d   :  { %v67_v18 = vadd.f32 %v224_v12, %v66_v16 }
  0x9f   :  { %v71_v20 = vsel %vm70_vm3, %v224_v12, %v67_v18 }
  0xa0   :  { %v76_v21 = vsel %vm73_vm4, %v75_v19, %v71_v20 }
  0xa1   :  { %v78_v22 = vpack.c.bf16 %v76_v21, %v76_v21 }
  0xa3   :  { %206 = vmatmul.msk.bf16.vlgmr.msra.gmra.mxu1 %vm99_vm5, %v78_v22 }
 0x120   :  { %v112_v29 = vpop.f32.mrf.mxu1 }
 0x121   :  { %v113_v30 = vadd.f32 %v219_v28, %v112_v29 }
 0x123   :  { %v116_v31 = vmax.f32 %v113_v30, 0.0 }
 0x125   :  { %v117_v32 = vpack.c.bf16 %v116_v31, %v116_v31 }
 0x127   :  { %211 = vmatmul.msk.bf16.vlgmr.msra.gmra.mxu2 %vm134_vm7, %v117_v32 }
 0x128   :  { %v114_v33 = vpop.f32.mrf.mxu1 }
 0x1aa   :  { %v151_v35 = vpop.f32.mrf.mxu2 }
 0x1ab   :  { %v152_v36 = vadd.f32 %v220_v34, %v151_v35 }
 0x1ad   :  { %v212_v37 = vmul.f32 -1.442695, %v152_v36 }
 0x1af   :  { %225 = vpow2.f32 %v212_v37 }
 0x1b2   :  { %v153_v38 = vpop.f32.mrf.mxu2 }
 0x1b5   :  { %v226_v39 = vpop.eup %225 }
 0x1b6   :  { %v158_v40 = vadd.f32 1.0, %v226_v39 }
 0x1b8   :  { %227 = vrcp.f32 %v158_v40  ;;  %v170_v44 = vand.u32 2147483648, %v158_v40  ;;  %v168_v46 = vand.u32 2147483647, %v158_v40  ;;  %vm164_vm9 = vweird.f32 %v158_v40 }
 0x1ba   :  { %v171_v48 = vor.u32 1.1754944e-38, %v170_v44  ;;  %vm169_vm12 = vcmp.eq.f32.partialorder %v168_v46, 8.507059e+37 }
 0x1be   :  { %v228_v41 = vpop.eup %227 }
 0x1bf   :  { %v160_v42 = vmul.f32 %v228_v41, %v158_v40  ;;  %vm165_vm8 = vweird.f32 %v228_v41 }
 0x1c0   :  { %vm166_vm10 = vmor %vm164_vm9, %vm165_vm8 }
 0x1c1   :  { %v161_v43 = vsub.f32 1.0, %v160_v42 }
 0x1c3   :  { %v162_v45 = vmul.f32 %v228_v41, %v161_v43 }
 0x1c5   :  { %v163_v47 = vadd.f32 %v228_v41, %v162_v45 }
 0x1c7   :  { %v167_v49 = vsel %vm166_vm10, %v228_v41, %v163_v47 }
 0x1c8   :  { %v172_v50 = vsel %vm169_vm12, %v171_v48, %v167_v49 }
 0x1c9   :  { %175 = vst.msk [vmem:[#allocation2] sm:$0xf] %vm174_vm11, %v172_v50 }
 0x1ca   :  { %186 = dma.vmem_to_hbm [thread:$0]  %s182_s5, 64, %s184_s6, [#allocation3]  }
 0x1cb   :  { %253 = dma.done.wait [#allocation3], 64  }
 0x1cc   :  { %254 = vsyncadd [#allocation3], 4294967232 }
 0x1cd   :  { %191 = vsyncpa [#allocation3], 1 }

</bundles_post_ra>
